<compile_context>
chip_gen: v7x
topology: tpu7x:2x2x1
jax: 0.10.0
libtpu: 0.0.40
codegen_flags: <defaults>
</compile_context>

<pallas_src>
import math
import jax
import jax.numpy as jnp
from jax.experimental import pallas as pl
from jax.experimental.pallas import tpu as pltpu

D_IN = 768
D_HID = 32
_MIX = (0.5, 0.4, 0.1)  # fixed expert mixture from MOE_Adapter.forward


def moe_adapter_kernel(x_ref, wd_ref, bd_ref, wu_ref, bu_ref, o_ref):
    # x_ref : (TM, 768)   tokens tile (input dtype)
    # wd_ref: (768, 32)   folded down-proj weights, bf16
    # bd_ref: (1, 32)     folded down-proj bias, f32
    # wu_ref: (32, 768)   folded up-proj weights, bf16
    # bu_ref: (1, 768)    folded up-proj bias, f32
    # o_ref : (TM, 768)
    x = x_ref[...].astype(jnp.bfloat16)
    h = jnp.dot(x, wd_ref[...], preferred_element_type=jnp.float32) + bd_ref[...]
    h = jnp.maximum(h, 0.0).astype(jnp.bfloat16)          # ReLU
    out = jnp.dot(h, wu_ref[...], preferred_element_type=jnp.float32) + bu_ref[...]
    o_ref[...] = out.astype(o_ref.dtype)


def _round_up(n, m):
    return ((n + m - 1) // m) * m


def _vmem_capacity_bytes():
    """Physical VMEM per TensorCore; conservative fallback if the query fails."""
    try:
        cap = getattr(pltpu.get_tpu_info(), "vmem_capacity_bytes", None)
        if cap:
            return int(cap)
    except Exception:
        pass
    return 64 * 1024 * 1024  # v7x-sized fallback: safe on every generation


def _const_spec(shape):
    """BlockSpec for a grid-invariant operand (weights/biases): single-buffered."""
    index_map = lambda i: (0,) * len(shape)
    try:
        return pl.BlockSpec(shape, index_map, pipeline_mode=pl.Buffered(1))
    except TypeError:  # older jax without pipeline_mode on BlockSpec
        return pl.BlockSpec(shape, index_map)


def moe_adapter(x, wd, bd, wu, bu, *, tile_m=None):
    """MOE_Adapter forward.

    x : (..., 768)      any float dtype (output dtype follows x)
    wd: (3, 768, 32)    down-proj weights (in x out layout)
    bd: (3, 32)         down-proj biases
    wu: (3, 32, 768)    up-proj weights (in x out layout)
    bu: (3, 768)        up-proj biases
    """
    orig_shape = x.shape
    x2d = x.reshape(-1, D_IN)
    M = x2d.shape[0]
    itemsize = jnp.dtype(x.dtype).itemsize
    vmem_cap = _vmem_capacity_bytes()

    # ---- Tile selection: big lane-dense tiles, no padding of M. ----
    if tile_m is None:
        # Rough VMEM bytes per tile row: double-buffered in+out tiles plus the
        # in-kernel bf16 copies / f32 accumulator temporaries.
        per_row = 4 * D_IN * itemsize + 6 * D_IN + 8 * D_HID
        vmem_rows = max(256, (int(vmem_cap * 0.5) // per_row) // 8 * 8)
        if M <= 256:
            tile_m = _round_up(max(M, 1), 8)        # single small tile
        else:
            # >= 2 grid steps so both v7x TensorCores get work; <= 2048 rows,
            # and never more than the per-generation VMEM budget allows.
            tile_m = min(2048, vmem_rows, _round_up((M + 1) // 2, 8))
    else:
        tile_m = _round_up(tile_m, 8)
    # Ragged tail block is clipped/masked by Pallas' bounded output DMA.
    grid = (pl.cdiv(M, tile_m),)

    # ---- Fold the fixed expert mixture into the weights (exact up to fp
    # rounding), then pre-cast weights to bf16 once. ----
    mix = jnp.asarray(_MIX, jnp.float32)
    wd_f = jnp.einsum("e,eio->io", mix, wd.astype(jnp.float32)).astype(jnp.bfloat16)
    bd_f = (mix @ bd.astype(jnp.float32)).reshape(1, D_HID)
    wu_f = jnp.einsum("e,eio->io", mix, wu.astype(jnp.float32)).astype(jnp.bfloat16)
    bu_f = (mix @ bu.astype(jnp.float32)).reshape(1, D_IN)

    # ---- Generation-aware VMEM limit: never above 75% of physical VMEM. ----
    vmem_est = (4 * tile_m * D_IN * itemsize                # in+out tiles, double-buffered
                + 2 * (D_IN * D_HID + D_HID * D_IN)         # bf16 weights (single-buffered)
                + 4 * (D_HID + D_IN)                        # f32 biases
                + tile_m * (6 * D_IN + 8 * D_HID))          # kernel temporaries
    vmem_limit = min(max(int(vmem_est * 3 // 2), 32 * 1024 * 1024),
                     int(vmem_cap * 3 // 4))

    cost = pl.CostEstimate(
        flops=2 * 2 * M * D_IN * D_HID,                     # two (M,768)x(768,32)-class matmuls
        transcendentals=0,
        bytes_accessed=int(2 * M * D_IN * itemsize
                           + 2 * (D_IN * D_HID + D_HID * D_IN)
                           + 4 * (D_HID + D_IN)),
    )

    out = pl.pallas_call(
        moe_adapter_kernel,
        out_shape=jax.ShapeDtypeStruct((M, D_IN), x.dtype),
        grid_spec=pltpu.PrefetchScalarGridSpec(
            num_scalar_prefetch=0,
            grid=grid,
            in_specs=[
                pl.BlockSpec((tile_m, D_IN), lambda i: (i, 0)),   # x tile
                _const_spec((D_IN, D_HID)),                       # folded down weights
                _const_spec((1, D_HID)),                          # folded down bias
                _const_spec((D_HID, D_IN)),                       # folded up weights
                _const_spec((1, D_IN)),                           # folded up bias
            ],
            out_specs=pl.BlockSpec((tile_m, D_IN), lambda i: (i, 0)),
        ),
        compiler_params=pltpu.CompilerParams(
            dimension_semantics=("parallel",),
            vmem_limit_bytes=vmem_limit,
        ),
        cost_estimate=cost,
    )(x2d, wd_f, bd_f, wu_f, bu_f)

    return out.reshape(orig_shape)


def init_params(key):
    """Deterministic init matching MOE_Adapter.__init__:
       down weights: kaiming_uniform_(a=sqrt(5))  -> U(-b, b), b = sqrt(1/fan_in)
       up weights / all biases: zeros."""
    a = math.sqrt(5.0)
    gain = math.sqrt(2.0 / (1.0 + a * a))
    bound = gain * math.sqrt(3.0 / D_IN)  # = sqrt(1/768)

    keys = jax.random.split(key, 3)
    # PyTorch Linear weight is (out, in); store transposed (in, out) for the kernel.
    wd = jnp.stack([
        jax.random.uniform(keys[i], (D_IN, D_HID), jnp.float32,
                           minval=-bound, maxval=bound)
        for i in range(3)
    ])                                              # (3, 768, 32)
    bd = jnp.zeros((3, D_HID), jnp.float32)         # (3, 32)
    wu = jnp.zeros((3, D_HID, D_IN), jnp.float32)   # (3, 32, 768)
    bu = jnp.zeros((3, D_IN), jnp.float32)          # (3, 768)
    return wd, bd, wu, bu


def moe_adapter_ref(x, wd, bd, wu, bu):
    """Pure-JAX f32 reference of the PyTorch forward (6 matmuls, no folding)."""
    x0 = x @ wd[0] + bd[0]
    x1 = x @ wd[1] + bd[1]
    x2 = x @ wd[2] + bd[2]
    x_add = jax.nn.relu(0.5 * x0 + 0.4 * x1 + 0.1 * x2)
    u1 = x_add @ wu[0] + bu[0]
    u2 = x_add @ wu[1] + bu[1]
    u3 = x_add @ wu[2] + bu[2]
    return 0.5 * u1 + 0.4 * u2 + 0.1 * u3


if __name__ == "__main__":
    key = jax.random.PRNGKey(0)
    k_wd, k_wu, k_bd, k_bu, k_x, k_x2 = jax.random.split(key, 6)

    # Random parameters (module shapes) so the up-projection path is actually
    # exercised (the torch init zeroes it, which would make the test trivial).
    bound_d = math.sqrt(1.0 / D_IN)
    bound_u = math.sqrt(1.0 / D_HID)
    wd = jax.random.uniform(k_wd, (3, D_IN, D_HID), jnp.float32, -bound_d, bound_d)
    wu = jax.random.uniform(k_wu, (3, D_HID, D_IN), jnp.float32, -bound_u, bound_u)
    bd = jax.random.uniform(k_bd, (3, D_HID), jnp.float32, -bound_d, bound_d)
    bu = jax.random.uniform(k_bu, (3, D_IN), jnp.float32, -bound_u, bound_u)

    # Main check: (batch=2, seq=8, hidden=768), feature-last, f32.
    x = jax.random.normal(k_x, (2, 8, D_IN), jnp.float32)
    out = jax.block_until_ready(moe_adapter(x, wd, bd, wu, bu))
    ref = moe_adapter_ref(x.reshape(-1, D_IN), wd, bd, wu, bu).reshape(x.shape)
    assert out.shape == x.shape
    # bf16 matmul operands + folded mixture -> relaxed tolerance vs f32 reference.
    assert jnp.allclose(out, ref, atol=2e-2, rtol=2e-2), \
        float(jnp.max(jnp.abs(out - ref)))

    # Ragged M + multi-step grid with a masked tail block (M=37, tile_m=16 -> grid=3).
    x2 = jax.random.normal(k_x2, (37, D_IN), jnp.float32)
    out2 = jax.block_until_ready(moe_adapter(x2, wd, bd, wu, bu, tile_m=16))
    ref2 = moe_adapter_ref(x2, wd, bd, wu, bu)
    assert jnp.allclose(out2, ref2, atol=2e-2, rtol=2e-2), \
        float(jnp.max(jnp.abs(out2 - ref2)))

    # bf16 activations end-to-end (output dtype follows x).
    xb = x.astype(jnp.bfloat16)
    outb = jax.block_until_ready(moe_adapter(xb, wd, bd, wu, bu))
    assert outb.dtype == jnp.bfloat16
    assert jnp.allclose(outb.astype(jnp.float32), ref, atol=6e-2, rtol=6e-2)

    # Sanity check with the module's own init (zero up-proj -> exact zero output).
    wd0, bd0, wu0, bu0 = init_params(jax.random.PRNGKey(1))
    out0 = jax.block_until_ready(moe_adapter(x, wd0, bd0, wu0, bu0))
    assert jnp.allclose(out0, jnp.zeros_like(out0))

    print("KERNEL_OK")
</pallas_src>

<mosaic_0001>
module attributes {stable_mosaic.version = 11 : i64} {
  func.func @moe_adapter_kernel(%arg0: i32, %arg1: memref<16x768xf32, #tpu.memory_space<vmem>>, %arg2: memref<768x32xbf16, #tpu.memory_space<vmem>>, %arg3: memref<1x32xf32, #tpu.memory_space<vmem>>, %arg4: memref<32x768xbf16, #tpu.memory_space<vmem>>, %arg5: memref<1x768xf32, #tpu.memory_space<vmem>>, %arg6: memref<16x768xf32, #tpu.memory_space<vmem>>) attributes {dimension_semantics = [#tpu.dimension_semantics<parallel>], iteration_bounds = array<i64: 1>, scalar_prefetch = 0 : i64, scratch_operands = 0 : i64, tpu.core_type = #tpu.core_type<tc>, window_params = [{transform_indices = @transform_0, window_bounds = array<i64: 16, 768>}, {pipeline_mode = #tpu.pipeline_mode<synchronous>, transform_indices = @transform_1, window_bounds = array<i64: 768, 32>}, {pipeline_mode = #tpu.pipeline_mode<synchronous>, transform_indices = @transform_2, window_bounds = array<i64: 1, 32>}, {pipeline_mode = #tpu.pipeline_mode<synchronous>, transform_indices = @transform_3, window_bounds = array<i64: 32, 768>}, {pipeline_mode = #tpu.pipeline_mode<synchronous>, transform_indices = @transform_4, window_bounds = array<i64: 1, 768>}, {transform_indices = @transform_5, window_bounds = array<i64: 16, 768>}]} {
    %c0 = arith.constant 0 : index
    %c0_0 = arith.constant 0 : index
    %0 = vector.load %arg1[%c0, %c0_0] : memref<16x768xf32, #tpu.memory_space<vmem>>, vector<16x768xf32>
    %1 = arith.truncf %0 : vector<16x768xf32> to vector<16x768xbf16>
    %c0_1 = arith.constant 0 : index
    %c0_2 = arith.constant 0 : index
    %2 = vector.load %arg2[%c0_1, %c0_2] : memref<768x32xbf16, #tpu.memory_space<vmem>>, vector<768x32xbf16>
    %cst = arith.constant dense<0.000000e+00> : vector<16x32xf32>
    %3 = tpu.matmul %1, %2, %cst {dimension_numbers = #tpu.dot_dimension_numbers<[1], [0], [0], [1], [0, 0, 1, 1], [], []>} : vector<16x768xbf16>, vector<768x32xbf16>, vector<16x32xf32> -> vector<16x32xf32>
    %c0_3 = arith.constant 0 : index
    %c0_4 = arith.constant 0 : index
    %4 = vector.load %arg3[%c0_3, %c0_4] : memref<1x32xf32, #tpu.memory_space<vmem>>, vector<1x32xf32>
    %5 = vector.broadcast %4 : vector<1x32xf32> to vector<16x32xf32>
    %6 = arith.addf %3, %5 : vector<16x32xf32>
    %cst_5 = arith.constant 0.000000e+00 : f32
    %7 = vector.broadcast %cst_5 : f32 to vector<16x32xf32>
    %8 = arith.maximumf %6, %7 : vector<16x32xf32>
    %9 = arith.truncf %8 : vector<16x32xf32> to vector<16x32xbf16>
    %c0_6 = arith.constant 0 : index
    %c0_7 = arith.constant 0 : index
    %10 = vector.load %arg4[%c0_6, %c0_7] : memref<32x768xbf16, #tpu.memory_space<vmem>>, vector<32x768xbf16>
    %cst_8 = arith.constant dense<0.000000e+00> : vector<16x768xf32>
    %11 = tpu.matmul %9, %10, %cst_8 {dimension_numbers = #tpu.dot_dimension_numbers<[1], [0], [0], [1], [0, 0, 1, 1], [], []>} : vector<16x32xbf16>, vector<32x768xbf16>, vector<16x768xf32> -> vector<16x768xf32>
    %c0_9 = arith.constant 0 : index
    %c0_10 = arith.constant 0 : index
    %12 = vector.load %arg5[%c0_9, %c0_10] : memref<1x768xf32, #tpu.memory_space<vmem>>, vector<1x768xf32>
    %13 = vector.broadcast %12 : vector<1x768xf32> to vector<16x768xf32>
    %14 = arith.addf %11, %13 : vector<16x768xf32>
    %c0_11 = arith.constant 0 : index
    %c0_12 = arith.constant 0 : index
    %15 = vector.load %arg6[%c0_11, %c0_12] : memref<16x768xf32, #tpu.memory_space<vmem>>, vector<16x768xf32>
    tpu.vector_store %arg6[%c0_11, %c0_12], %14 {strides = array<i32>} : memref<16x768xf32, #tpu.memory_space<vmem>>, vector<16x768xf32>,
    return
  }
  func.func @transform_0(%arg0: i32) -> (i32, i32) {
    %c0_i32 = arith.constant 0 : i32
    %c0_i32_0 = arith.constant 0 : i32
    return %arg0, %c0_i32 : i32, i32
  }
  func.func @transform_1(%arg0: i32) -> (i32, i32) {
    %c0_i32 = arith.constant 0 : i32
    %c0_i32_0 = arith.constant 0 : i32
    %c0_i32_1 = arith.constant 0 : i32
    return %c0_i32, %c0_i32_0 : i32, i32
  }
  func.func @transform_2(%arg0: i32) -> (i32, i32) {
    %c0_i32 = arith.constant 0 : i32
    %c0_i32_0 = arith.constant 0 : i32
    %c0_i32_1 = arith.constant 0 : i32
    return %c0_i32, %c0_i32_0 : i32, i32
  }
  func.func @transform_3(%arg0: i32) -> (i32, i32) {
    %c0_i32 = arith.constant 0 : i32
    %c0_i32_0 = arith.constant 0 : i32
    %c0_i32_1 = arith.constant 0 : i32
    return %c0_i32, %c0_i32_0 : i32, i32
  }
  func.func @transform_4(%arg0: i32) -> (i32, i32) {
    %c0_i32 = arith.constant 0 : i32
    %c0_i32_0 = arith.constant 0 : i32
    %c0_i32_1 = arith.constant 0 : i32
    return %c0_i32, %c0_i32_0 : i32, i32
  }
  func.func @transform_5(%arg0: i32) -> (i32, i32) {
    %c0_i32 = arith.constant 0 : i32
    %c0_i32_0 = arith.constant 0 : i32
    return %arg0, %c0_i32 : i32, i32
  }
}

</mosaic_0001>

<bundles_post_ra>
// kernel: tpu_custom_call.1
= control target key start
LH: loop header
LB: loop body
LE: loop exit
PB: predicated region body
PF: predicated region fallthrough
CT: control target
= control target key end

     0   :  { %s1317_s0 = inlined_call_operand.vmem [shape: f32[16,768], index: 0, kind: input, shape index: {}]   ;;  %s1318_s1 = inlined_call_operand.vmem [shape: bf16[768,32], index: 1, kind: input, shape index: {}]   ;;  %s1319_s2 = inlined_call_operand.vmem [shape: f32[1,32], index: 2, kind: input, shape index: {}]   ;;  %s1320_s3 = inlined_call_operand.vmem [shape: bf16[32,768], index: 3, kind: input, shape index: {}]   ;;  %s1321_s4 = inlined_call_operand.vmem [shape: f32[1,768], index: 4, kind: input, shape index: {}]   ;;  %s1322_s5 = inlined_call_operand.hbm [shape: f32[16,768], index: 5, kind: output, shape index: {}]  }
   0x1   :  { %v956_v0 = vld [vmem:[%s1318_s1 + $0x40] sm:$0xff]   ;;  %v960_v4 = vld [vmem:[%s1318_s1 + $0x48] sm:$0xff]   ;;  %v964_v8 = vld [vmem:[%s1318_s1 + $0x50] sm:$0xff]  }
   0x2   :  { %v957_v1 = vld [vmem:[%s1318_s1] sm:$0xff]   ;;  %886 = vmatprep.subr.bf16.mxu0 %v956_v0  ;;  %v961_v5 = vld [vmem:[%s1318_s1 + $0x8] sm:$0xff]   ;;  %v965_v9 = vld [vmem:[%s1318_s1 + $0x10] sm:$0xff]  }
   0x3   :  { %v958_v2 = vld [vmem:[%s1318_s1 + $0xc0] sm:$0xff]   ;;  %887 = vmatpush3.bf16.msra.mxu0 %v957_v1  ;;  %v962_v6 = vld [vmem:[%s1318_s1 + $0xc8] sm:$0xff]   ;;  %v966_v10 = vld [vmem:[%s1318_s1 + $0xd0] sm:$0xff]  }
   0x4   :  { %v959_v3 = vld [vmem:[%s1318_s1 + $0x80] sm:$0xff]   ;;  %908 = vmatprep.subr.bf16.mxu1 %v958_v2  ;;  %888 = vmatprep.subr.bf16.mxu0 %v960_v4  ;;  %v963_v7 = vld [vmem:[%s1318_s1 + $0x88] sm:$0xff]   ;;  %v967_v11 = vld [vmem:[%s1318_s1 + $0x90] sm:$0xff]  }
   0x5   :  { %909 = vmatpush3.bf16.msra.mxu1 %v959_v3  ;;  %v968_v12 = vld [vmem:[%s1318_s1 + $0x58] sm:$0xff]   ;;  %v972_v16 = vld [vmem:[%s1318_s1 + $0x60] sm:$0xff]   ;;  %v976_v20 = vld [vmem:[%s1318_s1 + $0x68] sm:$0xff]  }
   0x6   :  { %910 = vmatprep.subr.bf16.mxu1 %v962_v6  ;;  %v969_v13 = vld [vmem:[%s1318_s1 + $0x18] sm:$0xff]   ;;  %v973_v17 = vld [vmem:[%s1318_s1 + $0x20] sm:$0xff]   ;;  %v977_v21 = vld [vmem:[%s1318_s1 + $0x28] sm:$0xff]  }
   0x7   :  { %889 = vmatpush3.bf16.msra.mxu0 %v961_v5  ;;  %v970_v14 = vld [vmem:[%s1318_s1 + $0xd8] sm:$0xff]   ;;  %v974_v18 = vld [vmem:[%s1318_s1 + $0xe0] sm:$0xff]   ;;  %v978_v22 = vld [vmem:[%s1318_s1 + $0xe8] sm:$0xff]  }
   0x8   :  { %890 = vmatprep.subr.bf16.mxu0 %v964_v8  ;;  %v971_v15 = vld [vmem:[%s1318_s1 + $0x98] sm:$0xff]   ;;  %v975_v19 = vld [vmem:[%s1318_s1 + $0xa0] sm:$0xff]   ;;  %v979_v23 = vld [vmem:[%s1318_s1 + $0xa8] sm:$0xff]  }
   0x9   :  { %911 = vmatpush3.bf16.msra.mxu1 %v963_v7  ;;  %v980_v24 = vld [vmem:[%s1318_s1 + $0x70] sm:$0xff]   ;;  %v984_v28 = vld [vmem:[%s1318_s1 + $0x78] sm:$0xff]   ;;  %v23_v31 = vld [vmem:[%s1317_s0 + $0x8] sm:$0xff] }
   0xa   :  { %912 = vmatprep.subr.bf16.mxu1 %v966_v10  ;;  %v981_v25 = vld [vmem:[%s1318_s1 + $0x30] sm:$0xff]   ;;  %v985_v29 = vld [vmem:[%s1318_s1 + $0x38] sm:$0xff]   ;;  %v22_v35 = vld [vmem:[%s1317_s0] sm:$0xff] }
   0xb   :  { %891 = vmatpush3.bf16.msra.mxu0 %v965_v9  ;;  %v982_v26 = vld [vmem:[%s1318_s1 + $0xf0] sm:$0xff]   ;;  %v986_v30 = vld [vmem:[%s1318_s1 + $0xf8] sm:$0xff]   ;;  %v988_v38 = vld [vmem:[%s1318_s1 + $0x140] sm:$0xff]  }
   0xc   :  { %892 = vmatprep.subr.bf16.mxu0 %v968_v12  ;;  %v983_v27 = vld [vmem:[%s1318_s1 + $0xb0] sm:$0xff]   ;;  %v29_v32 = vld [vmem:[%s1317_s0 + $0x38] sm:$0xff]  ;;  %v31_v40 = vld [vmem:[%s1317_s0 + $0x48] sm:$0xff] }
   0xd   :  { %913 = vmatpush3.bf16.msra.mxu1 %v967_v11  ;;  %v35_v33 = vpack.c.bf16 %v29_v32, %v23_v31  ;;  %v987_v34 = vld [vmem:[%s1318_s1 + $0xb8] sm:$0xff]   ;;  %v28_v36 = vld [vmem:[%s1317_s0 + $0x30] sm:$0xff]  ;;  %v989_v42 = vld [vmem:[%s1318_s1 + $0x100] sm:$0xff]  }
   0xe   :  { %914 = vmatprep.subr.bf16.mxu1 %v970_v14  ;;  %v34_v37 = vpack.c.bf16 %v28_v36, %v22_v35  ;;  %v25_v39 = vld [vmem:[%s1317_s0 + $0x18] sm:$0xff]  ;;  %v24_v43 = vld [vmem:[%s1317_s0 + $0x10] sm:$0xff]  ;;  %v30_v44 = vld [vmem:[%s1317_s0 + $0x40] sm:$0xff] }
   0xf   :  { %893 = vmatpush3.bf16.msra.mxu0 %v969_v13  ;;  %463 = vmatprep.mubr.bf16.mxu0 %v35_v33  ;;  %v37_v41 = vpack.c.bf16 %v31_v40, %v25_v39  ;;  %v36_v45 = vpack.c.bf16 %v30_v44, %v24_v43  ;;  %v990_v46 = vld [vmem:[%s1318_s1 + $0x148] sm:$0xff]   ;;  %v992_v48 = vld [vmem:[%s1318_s1 + $0x150] sm:$0xff]   ;;  %v994_v50 = vld [vmem:[%s1318_s1 + $0x158] sm:$0xff]  }
  0x10   :  { %894 = vmatprep.subr.bf16.mxu0 %v972_v16  ;;  %v991_v47 = vld [vmem:[%s1318_s1 + $0x108] sm:$0xff]   ;;  %v993_v49 = vld [vmem:[%s1318_s1 + $0x110] sm:$0xff]   ;;  %v995_v51 = vld [vmem:[%s1318_s1 + $0x118] sm:$0xff]  }
  0x11   :  { %915 = vmatpush3.bf16.msra.mxu1 %v971_v15  ;;  %504 = vmatprep.mubr.bf16.mxu1 %v37_v41  ;;  %v996_v52 = vld [vmem:[%s1318_s1 + $0x160] sm:$0xff]   ;;  %v998_v54 = vld [vmem:[%s1318_s1 + $0x168] sm:$0xff]   ;;  %v33_v57 = vld [vmem:[%s1317_s0 + $0x58] sm:$0xff] }
  0x12   :  { %916 = vmatprep.subr.bf16.mxu1 %v974_v18  ;;  %v997_v53 = vld [vmem:[%s1318_s1 + $0x120] sm:$0xff]   ;;  %v27_v55 = vld [vmem:[%s1317_s0 + $0x28] sm:$0xff]  ;;  %v1000_v58 = vld [vmem:[%s1318_s1 + $0x170] sm:$0xff]  }
  0x13   :  { %895 = vmatpush3.bf16.msra.mxu0 %v973_v17  ;;  %v999_v56 = vld [vmem:[%s1318_s1 + $0x128] sm:$0xff]   ;;  %v39_v59 = vpack.c.bf16 %v33_v57, %v27_v55 }
  0x14   :  { %896 = vmatprep.subr.bf16.mxu0 %v976_v20 }
  0x15   :  { %917 = vmatpush3.bf16.msra.mxu1 %v975_v19 }
  0x16   :  { %918 = vmatprep.subr.bf16.mxu1 %v978_v22 }
  0x17   :  { %897 = vmatpush3.bf16.msra.mxu0 %v977_v21 }
  0x18   :  { %898 = vmatprep.subr.bf16.mxu0 %v980_v24 }
  0x19   :  { %919 = vmatpush3.bf16.msra.mxu1 %v979_v23 }
  0x1a   :  { %920 = vmatprep.subr.bf16.mxu1 %v982_v26 }
  0x1b   :  { %899 = vmatpush3.bf16.msra.mxu0 %v981_v25 }
  0x1c   :  { %900 = vmatprep.subr.bf16.mxu0 %v984_v28 }
  0x1d   :  { %921 = vmatpush3.bf16.msra.mxu1 %v983_v27 }
  0x1e   :  { %922 = vmatprep.subr.bf16.mxu1 %v986_v30 }
  0x1f   :  { %901 = vmatpush3.bf16.msra.mxu0 %v985_v29 }
  0x20   :  { %930 = vmatprep.subr.bf16.mxu0 %v988_v38 }
  0x21   :  { %923 = vmatpush3.bf16.msra.mxu1 %v987_v34 }
  0x22   :  { %464 = vmatmul.mubr.bf16.vlgmr.msra.gmra.mrb[0].mxu0 %v34_v37 }
  0x23   :  { %931 = vmatpush3.bf16.msra.mxu0 %v989_v42  ;;  %545 = vmatprep.mubr.bf16.mxu0 %v39_v59 }
  0x24   :  { %505 = vmatmul.mubr.bf16.vlgmr.msra.gmra.mrb[0].mxu1 %v36_v45  ;;  %932 = vmatprep.subr.bf16.mxu0 %v990_v46 }
  0x27   :  { %933 = vmatpush3.bf16.msra.mxu0 %v991_v47 }
  0x28   :  { %934 = vmatprep.subr.bf16.mxu0 %v992_v48 }
  0x2b   :  { %935 = vmatpush3.bf16.msra.mxu0 %v993_v49 }
  0x2c   :  { %936 = vmatprep.subr.bf16.mxu0 %v994_v50 }
  0x2f   :  { %937 = vmatpush3.bf16.msra.mxu0 %v995_v51 }
  0x30   :  { %938 = vmatprep.subr.bf16.mxu0 %v996_v52 }
  0x33   :  { %939 = vmatpush3.bf16.msra.mxu0 %v997_v53 }
  0x34   :  { %940 = vmatprep.subr.bf16.mxu0 %v998_v54 }
  0x35   :  { %10 = vsyncpa [#allocation3], 0  ;;  %v1001_v60 = vld [vmem:[%s1318_s1 + $0x130] sm:$0xff]   ;;  %v1002_v61 = vld [vmem:[%s1318_s1 + $0x178] sm:$0xff]   ;;  %v1046_v7 = vmov 0   ;;  %vm661_vm0 = vcmask 261120   ;;  %v571_v43 = vlaneseq }
  0x36   :  { %v1003_v62 = vld [vmem:[%s1318_s1 + $0x138] sm:$0xff]   ;;  %v26_v63 = vld [vmem:[%s1317_s0 + $0x20] sm:$0xff]  ;;  %v32_v0 = vld [vmem:[%s1317_s0 + $0x50] sm:$0xff]  ;;  %697 = vmatprep.mubr.bf16.mxu1 %v1046_v7 }
  0x37   :  { %941 = vmatpush3.bf16.msra.mxu0 %v999_v56  ;;  %v38_v1 = vpack.c.bf16 %v32_v0, %v26_v63  ;;  %v1006_v2 = vld [vmem:[%s1320_s3 + $0x4] ss:$24 sps:$4 sm:$0xff]   ;;  %v1004_v3 = vld [vmem:[%s1320_s3] ss:$24 sps:$4 sm:$0xff]   ;;  %v1009_v4 = vld [vmem:[%s1320_s3 + $0x34] ss:$24 sps:$4 sm:$0xff]  }
  0x38   :  { %942 = vmatprep.subr.bf16.mxu0 %v1000_v58  ;;  %665 = vmatprep.subr.bf16.mxu1 %v1006_v2  ;;  %v1007_v5 = vld [vmem:[%s1320_s3 + $0x30] ss:$24 sps:$4 sm:$0xff]   ;;  %v1012_v6 = vld [vmem:[%s1320_s3 + $0xc] ss:$24 sps:$4 sm:$0xff]   ;;  %v822_v9 = vld [vmem:[%s1319_s2] ss:$0 sm:$0xff] }
  0x39   :  { %666 = vmatpush1.bf16.msra.mxu1 %v1004_v3  ;;  %v1010_v35 = vld [vmem:[%s1320_s3 + $0x8] ss:$24 sps:$4 sm:$0xff]   ;;  %v1015_v37 = vld [vmem:[%s1320_s3 + $0x3c] ss:$24 sps:$4 sm:$0xff]   ;;  %v1013_v38 = vld [vmem:[%s1320_s3 + $0x38] ss:$24 sps:$4 sm:$0xff]  }
  0x3a   :  { %667 = vmatprep.subr.bf16.mxu1 %v1009_v4  ;;  %v1018_v39 = vld [vmem:[%s1320_s3 + $0x14] ss:$24 sps:$4 sm:$0xff]   ;;  %v1016_v40 = vld [vmem:[%s1320_s3 + $0x10] ss:$24 sps:$4 sm:$0xff]   ;;  %v1021_v41 = vld [vmem:[%s1320_s3 + $0x44] ss:$24 sps:$4 sm:$0xff]  }
  0x3b   :  { %943 = vmatpush3.bf16.msra.mxu0 %v1001_v60  ;;  %v1019_v42 = vld [vmem:[%s1320_s3 + $0x40] ss:$24 sps:$4 sm:$0xff]   ;;  %v572_v44 = vshrl.u32 %v571_v43, 7  ;;  %s1047_s3 = smov [#allocation2]  }
  0x3c   :  { %944 = vmatprep.subr.bf16.mxu0 %v1002_v61  ;;  %v569_v46 = vld [vmem:[%s1321_s4] sm:$0x3f]  ;;  %s811_s4 = sshll.u32 %s1047_s3, 4  ;;  %s812_s4 = int_to_ptr.vmem [resolvable:$true] %s811_s4 }
  0x3d   :  { %668 = vmatpush1.bf16.msra.mxu1 %v1007_v5  ;;  %v573_v45 = vsub.s32 0, %v572_v44  ;;  %v577_v47 = vsub.s32 1, %v572_v44  ;;  %v581_v53 = vsub.s32 2, %v572_v44  ;;  %v585_v56 = vsub.s32 3, %v572_v44  ;;  %s1022_s13 = scalar_lea.vmem %s812_s4, 1536  ;;  %p1027_p1 = scmp.lt.s32.totalorder %s812_s4, %s812_s4 }
  0x3e   :  { %708 = vmatprep.subr.bf16.mxu1 %v1012_v6  ;;  %v593_v4 = vsub.s32 5, %v572_v44  ;;  %p1023_p0 = scmp.ne.s32.totalorder %s812_s4, %s1022_s13  ;;  %p1028_p2 = scmp.lt.s32.totalorder %s1022_s13, %s1022_s13 }
  0x3f   :  { %945 = vmatpush3.bf16.msra.mxu0 %v1003_v62  ;;  %v574_v48 = vrot.slane %v569_v46, %v573_v45  ;;  %v578_v49 = vrot.slane %v569_v46, %v577_v47  ;;  %v582_v60 = vrot.slane %v569_v46, %v581_v53  ;;  %v586_v61 = vrot.slane %v569_v46, %v585_v56 }
  0x40   :  { %p1029_p3 = por %p1028_p2, %p1027_p1 }
  0x42   :  { %546 = vmatmul.mubr.bf16.vlgmr.msra.gmra.mrb[4].mxu0 %v38_v1  ;;  %v589_v1 = vsub.s32 4, %v572_v44  ;;  %p1030_p4 = pnand %p1029_p3, %p1023_p0 }
  0xf5   :  { %v902_v8 = vpop.f32.mrb[0].mxu0 }
  0xf6   :  { %v903_v10 = vpop.f32.mrb[1].mxu0 }
  0xf7   :  { %v904_v11 = vadd.f32 %v903_v10, %v902_v8  ;;  %v905_v12 = vpop.f32.mrb[2].mxu0  ;;  %v924_v13 = vpop.f32.mrb[0].mxu1  ;;  %v590_v8 = vrot.slane %v569_v46, %v589_v1 }
  0xf8   :  { %v906_v14 = vpop.f32.mrb[3].mxu0  ;;  %v925_v17 = vpop.f32.mrb[1].mxu1 }
  0xf9   :  { %v466_v15 = vadd.f32 %v904_v11, %v822_v9  ;;  %v907_v16 = vadd.f32 %v906_v14, %v905_v12  ;;  %v926_v18 = vadd.f32 %v925_v17, %v924_v13  ;;  %v927_v19 = vpop.f32.mrb[2].mxu1 }
  0xfa   :  { %v928_v21 = vpop.f32.mrb[3].mxu1 }
  0xfb   :  { %v469_v20 = vadd.f32 %v907_v16, %v822_v9  ;;  %v507_v22 = vadd.f32 %v926_v18, %v466_v15  ;;  %v929_v23 = vadd.f32 %v928_v21, %v927_v19  ;;  %v594_v9 = vrot.slane %v569_v46, %v593_v4 }
  0xfd   :  { %v510_v24 = vadd.f32 %v929_v23, %v469_v20 }
 0x115   :  { %v946_v25 = vpop.f32.mrb[4].mxu0 }
 0x116   :  { %v947_v26 = vpop.f32.mrb[5].mxu0 }
 0x117   :  { %v948_v27 = vadd.f32 %v947_v26, %v946_v25  ;;  %v949_v28 = vpop.f32.mrb[6].mxu0 }
 0x118   :  { %v950_v29 = vpop.f32.mrb[7].mxu0 }
 0x119   :  { %v548_v30 = vadd.f32 %v948_v27, %v507_v22  ;;  %v951_v31 = vadd.f32 %v950_v29, %v949_v28 }
 0x11b   :  { %v551_v32 = vadd.f32 %v951_v31, %v510_v24  ;;  %v554_v33 = vmax.f32 %v548_v30, 0.0 }
 0x11d   :  { %v555_v34 = vmax.f32 %v551_v32, 0.0 }
 0x11f   :  { %v556_v36 = vpack.c.bf16 %v555_v34, %v554_v33 }
 0x121   :  { %883 = vmatmul.mubr.msk.bf16.vlgmr.msra.gmra.mrb[4].mxu1 %vm661_vm0, %v556_v36 }
 0x122   :  { %709 = vmatpush1.bf16.msra.mxu1 %v1010_v35  ;;  %740 = vmatprep.mubr.bf16.mxu1 %v1046_v7 }
 0x123   :  { %710 = vmatprep.subr.bf16.mxu1 %v1015_v37 }
 0x126   :  { %711 = vmatpush1.bf16.msra.mxu1 %v1013_v38 }
 0x127   :  { %751 = vmatprep.subr.bf16.mxu1 %v1018_v39 }
 0x129   :  { %884 = vmatmul.mubr.msk.bf16.vlgmr.msra.gmra.mrb[8].mxu1 %vm661_vm0, %v556_v36 }
 0x12a   :  { %752 = vmatpush1.bf16.msra.mxu1 %v1016_v40  ;;  %783 = vmatprep.mubr.bf16.mxu1 %v1046_v7 }
 0x12b   :  { %753 = vmatprep.subr.bf16.mxu1 %v1021_v41 }
 0x12e   :  { %754 = vmatpush1.bf16.msra.mxu1 %v1019_v42 }
 0x131   :  { %885 = vmatmul.mubr.msk.bf16.vlgmr.msra.gmra.mrb[12].mxu1 %vm661_vm0, %v556_v36 }
 0x1f4   :  { %v699_v50 = vpop.f32.mrb[4].mxu1 }
 0x1f5   :  { %v700_v51 = vadd.f32 %v699_v50, %v574_v48  ;;  %v701_v52 = vpop.f32.mrb[5].mxu1 }
 0x1f6   :  { %v702_v54 = vadd.f32 %v701_v52, %v578_v49  ;;  %v703_v55 = vpop.f32.mrb[6].mxu1 }
 0x1f7   :  { %794 = vst [vmem:[#allocation2] sm:$0xff] %v700_v51  ;;  %v704_v57 = vadd.f32 %v703_v55, %v574_v48  ;;  %v705_v58 = vpop.f32.mrb[7].mxu1 }
 0x1f8   :  { %795 = vst [vmem:[#allocation2 + $0x8] sm:$0xff] %v702_v54  ;;  %v706_v59 = vadd.f32 %v705_v58, %v578_v49 }
 0x1f9   :  { %800 = vst [vmem:[#allocation2 + $0x30] sm:$0xff] %v704_v57 }
 0x1fa   :  { %801 = vst [vmem:[#allocation2 + $0x38] sm:$0xff] %v706_v59 }
 0x1fc   :  { %v742_v62 = vpop.f32.mrb[8].mxu1 }
 0x1fd   :  { %v743_v63 = vadd.f32 %v742_v62, %v582_v60  ;;  %v744_v0 = vpop.f32.mrb[9].mxu1 }
 0x1fe   :  { %v745_v2 = vadd.f32 %v744_v0, %v586_v61  ;;  %v746_v3 = vpop.f32.mrb[10].mxu1 }
 0x1ff   :  { %796 = vst [vmem:[#allocation2 + $0x10] sm:$0xff] %v743_v63  ;;  %v747_v5 = vadd.f32 %v746_v3, %v582_v60  ;;  %v748_v6 = vpop.f32.mrb[11].mxu1 }
 0x200   :  { %797 = vst [vmem:[#allocation2 + $0x18] sm:$0xff] %v745_v2  ;;  %v749_v7 = vadd.f32 %v748_v6, %v586_v61 }
 0x201   :  { %802 = vst [vmem:[#allocation2 + $0x40] sm:$0xff] %v747_v5 }
 0x202   :  { %803 = vst [vmem:[#allocation2 + $0x48] sm:$0xff] %v749_v7 }
 0x204   :  { %v785_v10 = vpop.f32.mrb[12].mxu1 }
 0x205   :  { %v786_v11 = vadd.f32 %v785_v10, %v590_v8  ;;  %v787_v12 = vpop.f32.mrb[13].mxu1 }
 0x206   :  { %v788_v13 = vadd.f32 %v787_v12, %v594_v9  ;;  %v789_v14 = vpop.f32.mrb[14].mxu1 }
 0x207   :  { %798 = vst [vmem:[#allocation2 + $0x20] sm:$0xff] %v786_v11  ;;  %v790_v15 = vadd.f32 %v789_v14, %v590_v8  ;;  %v791_v16 = vpop.f32.mrb[15].mxu1 }
 0x208   :  { %799 = vst [vmem:[#allocation2 + $0x28] sm:$0xff] %v788_v13  ;;  %v792_v17 = vadd.f32 %v791_v16, %v594_v9 }
 0x209   :  { %804 = vst [vmem:[#allocation2 + $0x50] sm:$0xff] %v790_v15 }
 0x20a   :  { %805 = vst [vmem:[#allocation2 + $0x58] sm:$0xff] %v792_v17 }
 0x20b   :  { %1033 = shalt.err (!%p1030_p4)
}
 0x20c   :  { %s1034_s16 = scalar_lea.hbm %s1322_s5, 1536 }
 0x20d   :  { %p1035_p5 = scmp.ne.s32.totalorder %s1322_s5, %s1034_s16  ;;  %p1038_p6 = scmp.lt.u32.totalorder %s1034_s16, %s1322_s5 }
 0x20f   :  { %p1040_p7 = pnand %p1038_p6, %p1035_p5 }
 0x211   :  { %1043 = shalt.err (!%p1040_p7)
}
 0x212   :  { %s1048_s19 = smov 768   ;;  %s1049_s20 = smov 48  }
 0x213   :  { %817 = dma.vmem_to_hbm [thread:$0]  %s812_s4, 1536, %s1322_s5, [#allocation3], %s1048_s19, %s1048_s19, %s1049_s20  }
 0x214   :  { %1044 = dma.done.wait [#allocation3], 1536  }
 0x215   :  { %1045 = vsyncadd [#allocation3], 4294965760 }
 0x216   :  { %821 = vsyncpa [#allocation3], 1 }

</bundles_post_ra>
